<compile_context>
chip_gen: v5e
topology: v5e:2x2
jax: 0.10.0
libtpu: 0.0.40
codegen_flags: <defaults>
</compile_context>

<pallas_src>
import functools

import jax
import jax.numpy as jnp
from jax.experimental import pallas as pl
from jax.experimental.pallas import tpu as pltpu

LANE = 128            # lane width of the flattened slab
MAX_TILE_ROWS = 2048  # 2048*128*4B = 1 MiB per input per grid step


def _focal_terms(pt, tgt, *, gamma, gamma_is_int, alpha):
    """Elementwise focal loss in f32 (same formula as the torch module)."""
    log_pt = jnp.log(pt)
    log_1mpt = jnp.log(1.0 - pt)
    if gamma_is_int:
        w_pos = (1.0 - pt) ** gamma          # integer_pow -> plain multiplies
        w_neg = pt ** gamma
    else:
        # Non-integer gamma: reuse the two logs (2 exps instead of 6 EUP ops).
        w_pos = jnp.exp(gamma * log_1mpt)
        w_neg = jnp.exp(gamma * log_pt)
    return (-alpha * w_pos * tgt * log_pt
            - (1.0 - alpha) * w_neg * (1.0 - tgt) * log_1mpt)


def _bce_focal_loss_kernel(x_ref, t_ref, o_ref, *,
                           gamma, gamma_is_int, alpha,
                           tiles_per_core, num_tiles, tile_rows,
                           rows_in_last_tile):
    c = pl.program_id(0)   # core axis      ("parallel")
    j = pl.program_id(1)   # reduction axis ("arbitrary")

    # Per-core accumulator = the resident (8, LANE) output block (one f32 vreg).
    @pl.when(j == 0)
    def _():
        o_ref[...] = jnp.zeros_like(o_ref)

    pt = x_ref[...].astype(jnp.float32)
    tgt = t_ref[...].astype(jnp.float32)
    loss = _focal_terms(pt, tgt, gamma=gamma, gamma_is_int=gamma_is_int,
                        alpha=alpha)

    def accumulate(val):
        # Fold tile_rows -> 8 sublanes with pure-VALU vreg adds; one vld + one
        # vst of the accumulator per grid step regardless of tile size.
        o_ref[...] += val.reshape(-1, 8, LANE).sum(axis=0)

    if rows_in_last_tile == tile_rows:
        # Rows divide the tile evenly: no padded rows anywhere, no mask.
        accumulate(loss)
    else:
        # Only the globally-last tile contains padded (garbage) rows.
        is_last = (c * tiles_per_core + j) == (num_tiles - 1)

        @pl.when(jnp.logical_not(is_last))
        def _():
            accumulate(loss)

        @pl.when(is_last)
        def _():
            row = jax.lax.broadcasted_iota(jnp.int32, loss.shape, 0)
            accumulate(jnp.where(row < rows_in_last_tile, loss, 0.0))


@functools.partial(jax.jit, static_argnames=("gamma", "alpha", "reduction"))
def bce_focal_loss(_input, target, gamma=2, alpha=0.25,
                   reduction="elementwise_mean"):
    """Pallas equivalent of BCEFocalLoss.forward. Inputs may have any shape."""
    assert _input.shape == target.shape
    if reduction not in ("elementwise_mean", "sum"):
        # TODO(synk): reduction='none' (unreduced elementwise output) not implemented.
        raise NotImplementedError("only 'elementwise_mean' and 'sum' reductions")

    n = int(_input.size)
    gamma_is_int = float(gamma).is_integer()
    gamma = int(gamma) if gamma_is_int else float(gamma)
    alpha = float(alpha)

    xf = _input.reshape(-1)
    tf = target.reshape(-1)

    rows = n // LANE
    rows = rows if rows >= 8 else 0      # <8 full lanes: not worth a kernel
    rem = n - rows * LANE                # lane tail handled by a jnp epilogue

    total = jnp.float32(0.0)

    if rows > 0:
        n_main = rows * LANE
        # Largest multiple-of-8 tile <= rows (block never exceeds the array;
        # the trailing partial block, if any, is masked in-kernel).
        tile_rows = min(MAX_TILE_ROWS, (rows // 8) * 8)
        num_tiles = -(-rows // tile_rows)
        # v7x megacore: split the tile loop across both TCs when it splits
        # evenly (sequential, essentially free, on single-TC v5e/v6e).
        num_cores = 2 if (num_tiles >= 2 and num_tiles % 2 == 0) else 1
        tiles_per_core = num_tiles // num_cores
        rows_in_last_tile = rows - (num_tiles - 1) * tile_rows

        if rem == 0:
            # Typical NN shapes: pure reshape, no extra HBM pass.
            x2 = xf.reshape(rows, LANE)
            t2 = tf.reshape(rows, LANE)
        else:
            # Rare ragged case: kernel runs on the lane-aligned prefix.
            x2 = xf[:n_main].reshape(rows, LANE)
            t2 = tf[:n_main].reshape(rows, LANE)

        kernel = functools.partial(
            _bce_focal_loss_kernel, gamma=gamma, gamma_is_int=gamma_is_int,
            alpha=alpha, tiles_per_core=tiles_per_core, num_tiles=num_tiles,
            tile_rows=tile_rows, rows_in_last_tile=rows_in_last_tile)

        partials = pl.pallas_call(
            kernel,
            out_shape=jax.ShapeDtypeStruct((num_cores * 8, LANE), jnp.float32),
            grid_spec=pltpu.PrefetchScalarGridSpec(
                num_scalar_prefetch=0,
                grid=(num_cores, tiles_per_core),
                in_specs=[
                    pl.BlockSpec((tile_rows, LANE),
                                 lambda c, j: (c * tiles_per_core + j, 0)),
                    pl.BlockSpec((tile_rows, LANE),
                                 lambda c, j: (c * tiles_per_core + j, 0)),
                ],
                out_specs=pl.BlockSpec((8, LANE), lambda c, j: (c, 0)),
            ),
            compiler_params=pltpu.CompilerParams(
                dimension_semantics=("parallel", "arbitrary")),
            cost_estimate=pl.CostEstimate(
                flops=12 * n_main,
                transcendentals=2 * n_main,
                bytes_accessed=n_main * (x2.dtype.itemsize + t2.dtype.itemsize)
                + num_cores * 8 * LANE * 4),
        )(x2, t2)
        total = total + jnp.sum(partials)

    if rem > 0:
        xt = xf[rows * LANE:].astype(jnp.float32)
        tt = tf[rows * LANE:].astype(jnp.float32)
        total = total + jnp.sum(
            _focal_terms(xt, tt, gamma=gamma, gamma_is_int=gamma_is_int,
                         alpha=alpha))

    if reduction == "elementwise_mean":
        return total / n
    return total


def bce_focal_loss_ref(x, t, gamma=2, alpha=0.25, reduction="elementwise_mean"):
    loss = (-alpha * (1.0 - x) ** gamma * t * jnp.log(x)
            - (1.0 - alpha) * x ** gamma * (1.0 - t) * jnp.log(1.0 - x))
    if reduction == "elementwise_mean":
        return jnp.mean(loss)
    elif reduction == "sum":
        return jnp.sum(loss)
    return loss


if __name__ == "__main__":
    key = jax.random.PRNGKey(0)
    k_p, k_t = jax.random.split(key)

    # Small shapes consistent with an elementwise loss over prediction maps.
    batch, channels, spatial = 2, 4, 16
    shape = (batch, channels, spatial, spatial)

    # Predicted probabilities in (0, 1), away from the log singularities.
    pt = jax.random.uniform(k_p, shape, jnp.float32, minval=0.05, maxval=0.95)
    target = jax.random.bernoulli(k_t, p=0.5, shape=shape).astype(jnp.float32)

    loss = jax.block_until_ready(
        bce_focal_loss(pt, target, gamma=2, alpha=0.25,
                       reduction="elementwise_mean"))
    ref = bce_focal_loss_ref(pt, target)
    assert loss.shape == ()
    assert jnp.allclose(loss, ref, atol=1e-5, rtol=1e-5), (loss, ref)

    # 'sum' reduction path.
    loss_sum = jax.block_until_ready(bce_focal_loss(pt, target, reduction="sum"))
    ref_sum = bce_focal_loss_ref(pt, target, reduction="sum")
    assert jnp.allclose(loss_sum, ref_sum, atol=1e-4, rtol=1e-5), (loss_sum, ref_sum)

    # Ragged shape: exercises the masked last tile, the 2-core grid split and
    # the lane-tail epilogue (1705 elems = 13 full lanes + 41-element tail).
    shape2 = (5, 11, 31)
    pt2 = jax.random.uniform(k_p, shape2, jnp.float32, minval=0.05, maxval=0.95)
    tg2 = jax.random.bernoulli(k_t, p=0.5, shape=shape2).astype(jnp.float32)
    loss2 = jax.block_until_ready(bce_focal_loss(pt2, tg2))
    ref2 = bce_focal_loss_ref(pt2, tg2)
    assert jnp.allclose(loss2, ref2, atol=1e-5, rtol=1e-5), (loss2, ref2)

    print("KERNEL_OK")
</pallas_src>

<mosaic_0001>
module attributes {stable_mosaic.version = 11 : i64} {
  func.func @_bce_focal_loss_kernel(%arg0: i32, %arg1: i32, %arg2: memref<16x128xf32, #tpu.memory_space<vmem>>, %arg3: memref<16x128xf32, #tpu.memory_space<vmem>>, %arg4: memref<8x128xf32, #tpu.memory_space<vmem>>) attributes {dimension_semantics = [#tpu.dimension_semantics<parallel>, #tpu.dimension_semantics<arbitrary>], iteration_bounds = array<i64: 1, 1>, scalar_prefetch = 0 : i64, scratch_operands = 0 : i64, tpu.core_type = #tpu.core_type<tc>, window_params = [{transform_indices = @transform_0, window_bounds = array<i64: 16, 128>}, {transform_indices = @transform_1, window_bounds = array<i64: 16, 128>}, {transform_indices = @transform_2, window_bounds = array<i64: 8, 128>}]} {
    %c0_i32 = arith.constant 0 : i32
    %0 = arith.cmpi eq, %arg1, %c0_i32 : i32
    %1 = arith.extui %0 : i1 to i32
    %c0_i32_0 = arith.constant 0 : i32
    %2 = arith.cmpi ne, %1, %c0_i32_0 : i32
    scf.if %2 {
      %cst_13 = arith.constant 0.000000e+00 : f32
      %29 = vector.broadcast %cst_13 : f32 to vector<8x128xf32>
      %c0_14 = arith.constant 0 : index
      %c0_15 = arith.constant 0 : index
      %30 = vector.load %arg4[%c0_14, %c0_15] : memref<8x128xf32, #tpu.memory_space<vmem>>, vector<8x128xf32>
      tpu.vector_store %arg4[%c0_14, %c0_15], %29 {strides = array<i32>} : memref<8x128xf32, #tpu.memory_space<vmem>>, vector<8x128xf32>,
    } else {
    }
    %c0 = arith.constant 0 : index
    %c0_1 = arith.constant 0 : index
    %3 = vector.load %arg2[%c0, %c0_1] : memref<16x128xf32, #tpu.memory_space<vmem>>, vector<16x128xf32>
    %c0_2 = arith.constant 0 : index
    %c0_3 = arith.constant 0 : index
    %4 = vector.load %arg3[%c0_2, %c0_3] : memref<16x128xf32, #tpu.memory_space<vmem>>, vector<16x128xf32>
    %5 = math.log %3 : vector<16x128xf32>
    %cst = arith.constant 1.000000e+00 : f32
    %6 = vector.broadcast %cst : f32 to vector<16x128xf32>
    %7 = arith.subf %6, %3 : vector<16x128xf32>
    %8 = math.log %7 : vector<16x128xf32>
    %cst_4 = arith.constant 1.000000e+00 : f32
    %9 = vector.broadcast %cst_4 : f32 to vector<16x128xf32>
    %10 = arith.subf %9, %3 : vector<16x128xf32>
    %11 = arith.mulf %10, %10 : vector<16x128xf32>
    %12 = arith.mulf %3, %3 : vector<16x128xf32>
    %cst_5 = arith.constant -2.500000e-01 : f32
    %13 = vector.broadcast %cst_5 : f32 to vector<16x128xf32>
    %14 = arith.mulf %13, %11 : vector<16x128xf32>
    %15 = arith.mulf %14, %4 : vector<16x128xf32>
    %16 = arith.mulf %15, %5 : vector<16x128xf32>
    %cst_6 = arith.constant 7.500000e-01 : f32
    %17 = vector.broadcast %cst_6 : f32 to vector<16x128xf32>
    %18 = arith.mulf %17, %12 : vector<16x128xf32>
    %cst_7 = arith.constant 1.000000e+00 : f32
    %19 = vector.broadcast %cst_7 : f32 to vector<16x128xf32>
    %20 = arith.subf %19, %4 : vector<16x128xf32>
    %21 = arith.mulf %18, %20 : vector<16x128xf32>
    %22 = arith.mulf %21, %8 : vector<16x128xf32>
    %23 = arith.subf %16, %22 : vector<16x128xf32>
    %c0_8 = arith.constant 0 : index
    %c0_9 = arith.constant 0 : index
    %24 = vector.load %arg4[%c0_8, %c0_9] : memref<8x128xf32, #tpu.memory_space<vmem>>, vector<8x128xf32>
    %25 = vector.shape_cast %23 : vector<16x128xf32> to vector<2x8x128xf32>
    %cst_10 = arith.constant dense<0.000000e+00> : vector<8x128xf32>
    %26 = vector.multi_reduction <add>, %25, %cst_10 [0] : vector<2x8x128xf32> to vector<8x128xf32>
    %27 = arith.addf %24, %26 : vector<8x128xf32>
    %c0_11 = arith.constant 0 : index
    %c0_12 = arith.constant 0 : index
    %28 = vector.load %arg4[%c0_11, %c0_12] : memref<8x128xf32, #tpu.memory_space<vmem>>, vector<8x128xf32>
    tpu.vector_store %arg4[%c0_11, %c0_12], %27 {strides = array<i32>} : memref<8x128xf32, #tpu.memory_space<vmem>>, vector<8x128xf32>,
    return
  }
  func.func @transform_0(%arg0: i32, %arg1: i32) -> (i32, i32) {
    %c1_i32 = arith.constant 1 : i32
    %0 = arith.muli %arg0, %c1_i32 : i32
    %1 = arith.addi %0, %arg1 : i32
    %c0_i32 = arith.constant 0 : i32
    %c0_i32_0 = arith.constant 0 : i32
    return %1, %c0_i32 : i32, i32
  }
  func.func @transform_1(%arg0: i32, %arg1: i32) -> (i32, i32) {
    %c1_i32 = arith.constant 1 : i32
    %0 = arith.muli %arg0, %c1_i32 : i32
    %1 = arith.addi %0, %arg1 : i32
    %c0_i32 = arith.constant 0 : i32
    %c0_i32_0 = arith.constant 0 : i32
    return %1, %c0_i32 : i32, i32
  }
  func.func @transform_2(%arg0: i32, %arg1: i32) -> (i32, i32) {
    %c0_i32 = arith.constant 0 : i32
    %c0_i32_0 = arith.constant 0 : i32
    return %arg0, %c0_i32 : i32, i32
  }
}

</mosaic_0001>

<bundles_post_ra>
// kernel: bce_focal_loss.1
= control target key start
LH: loop header
LB: loop body
LE: loop exit
PB: predicated region body
PF: predicated region fallthrough
CT: control target
= control target key end

     0   :  { %s153_s0 = inlined_call_operand.vmem [shape: f32[16,128], index: 0, kind: input, shape index: {}]   ;;  %s154_s1 = inlined_call_operand.vmem [shape: f32[16,128], index: 1, kind: input, shape index: {}]   ;;  %s155_s2 = inlined_call_operand.vmem [shape: f32[8,128], index: 2, kind: output, shape index: {}]  }
   0x1   :  { %v60_v0 = vld [vmem:[%s153_s0] sm:$0xff]  ;;  %v61_v1 = vld [vmem:[%s153_s0 + $0x8] sm:$0xff] }
   0x2   :  { %v62_v2 = vld [vmem:[%s154_s1] sm:$0xff]  ;;  %115 = vlog2.f32 %v60_v0  ;;  %v68_v3 = vsub.f32 1.0, %v60_v0  ;;  %v69_v4 = vsub.f32 1.0, %v61_v1  ;;  %v76_v5 = vmul.f32 %v60_v0, %v60_v0  ;;  %v63_v6 = vld [vmem:[%s154_s1 + $0x8] sm:$0xff] }
   0x3   :  { %117 = vlog2.f32 %v61_v1  ;;  %v77_v7 = vmul.f32 %v61_v1, %v61_v1  ;;  %v86_v11 = vsub.f32 1.0, %v62_v2  ;;  %v87_v15 = vsub.f32 1.0, %v63_v6 }
   0x4   :  { %119 = vlog2.f32 %v68_v3  ;;  %v74_v8 = vmul.f32 %v68_v3, %v68_v3  ;;  %v75_v9 = vmul.f32 %v69_v4, %v69_v4  ;;  %v84_v10 = vmul.f32 0.75, %v76_v5 }
   0x5   :  { %121 = vlog2.f32 %v69_v4  ;;  %v85_v14 = vmul.f32 0.75, %v77_v7 }
   0x6   :  { %v78_v12 = vmul.f32 -0.25, %v74_v8  ;;  %v79_v13 = vmul.f32 -0.25, %v75_v9  ;;  %v88_v21 = vmul.f32 %v86_v11, %v84_v10 }
   0x7   :  { %v89_v24 = vmul.f32 %v87_v15, %v85_v14 }
   0x8   :  { %v116_v16 = vpop.eup %115  ;;  %v80_v17 = vmul.f32 %v78_v12, %v62_v2  ;;  %v81_v18 = vmul.f32 %v79_v13, %v63_v6 }
   0x9   :  { %v118_v19 = vpop.eup %117  ;;  %v65_v20 = vmul.f32 0.6931472, %v116_v16 }
   0xa   :  { %v120_v22 = vpop.eup %119  ;;  %v67_v23 = vmul.f32 0.6931472, %v118_v19 }
   0xb   :  { %v122_v25 = vpop.eup %121  ;;  %v71_v26 = vmul.f32 0.6931472, %v120_v22  ;;  %v82_v27 = vmul.f32 %v80_v17, %v65_v20 }
   0xc   :  { %v73_v28 = vmul.f32 0.6931472, %v122_v25  ;;  %v83_v29 = vmul.f32 %v81_v18, %v67_v23 }
   0xd   :  { %v90_v30 = vmul.f32 %v88_v21, %v71_v26 }
   0xe   :  { %v91_v31 = vmul.f32 %v89_v24, %v73_v28 }
   0xf   :  { %v92_v32 = vsub.f32 %v82_v27, %v90_v30 }
  0x10   :  { %v93_v33 = vsub.f32 %v83_v29, %v91_v31 }
  0x12   :  { %v95_v34 = vadd.f32 %v93_v33, %v92_v32 }
  0x14   :  { %97 = vst [vmem:[%s155_s2] sm:$0xff] %v95_v34 }

</bundles_post_ra>
